<compile_context>
chip_gen: v7x
topology: tpu7x:2x2x1
jax: 0.10.0
libtpu: 0.0.40
codegen_flags: <defaults>
</compile_context>

<pallas_src>
import jax
import jax.numpy as jnp
from jax.experimental import pallas as pl
from jax.experimental.pallas import tpu as pltpu


def _cdiv(a, b):
    return (a + b - 1) // b


def _make_kernel(rblk):
    def kernel(x_ref, scale_ref, bias_ref, o_ref):
        # x_ref / o_ref: (rblk, lblk) VMEM tiles.
        # scale_ref / bias_ref: full resident (rows_padded, 1) VMEM arrays.
        r0 = pl.program_id(0) * rblk
        if rblk % 8 == 0:
            r0 = pl.multiple_of(r0, 8)
        s = scale_ref[pl.ds(r0, rblk), :]
        b = bias_ref[pl.ds(r0, rblk), :]
        x = jnp.clip(x_ref[...].astype(jnp.float32), 0.0, 1.0)
        o_ref[...] = (x * s + b).astype(o_ref.dtype)   # lane-broadcast (rblk,1)
    return kernel


def _choose_blocks(rows, hw, itemsize, target_bytes=8 << 20):
    """Pick (rblk, lblk) obeying the (8,128) block constraint with a total
    block footprint near `target_bytes`."""
    rblk = 8 if rows >= 8 else rows
    lanes_budget = max(1, target_bytes // (rblk * itemsize))
    if lanes_budget >= hw:
        lblk = hw                                   # full lane extent
        rows_budget = max(1, target_bytes // (hw * itemsize))
        if rows_budget >= rows:
            rblk = rows
        elif rows >= 8:
            rblk = min(rows, max(8, (rows_budget // 8) * 8))
    else:
        # One 8-row strip already exceeds the target: tile the lane dim in
        # multiples of 128 (remainder handled by the cdiv grid / last block).
        lblk = min(hw, max(128, (lanes_budget // 128) * 128))

    # v7x has 2 TensorCores: make sure a bandwidth-bound problem has at least
    # two grid steps so the parallel axes can be split across them.
    total_bytes = rows * hw * itemsize
    if total_bytes >= (2 << 20) and _cdiv(rows, rblk) * _cdiv(hw, lblk) < 2:
        if rows >= 16:
            rblk = min(rblk, max(8, (_cdiv(rows, 2) // 8) * 8))
        elif hw >= 256:
            lblk = min(lblk, max(128, (_cdiv(hw, 2) // 128) * 128))
    return rblk, lblk


def _input_normalize_impl(x, new_mean, new_std, out_dtype=None, donate_x=False):
    """Pallas equivalent of InputNormalize.forward.

    x:        (B, C, H, W) float (values expected roughly in [0, 1])
    new_mean: per-channel mean, shape (C,) or (C, 1, 1)
    new_std:  per-channel std,  shape (C,) or (C, 1, 1)
    """
    B, C, H, W = x.shape
    rows, hw = B * C, H * W
    out_dtype = x.dtype if out_dtype is None else jnp.dtype(out_dtype)

    mean = jnp.ravel(new_mean).astype(jnp.float32)
    std = jnp.ravel(new_std).astype(jnp.float32)
    scale = 1.0 / std                        # precompute: no in-kernel divide
    bias = -mean * scale

    in_itemsize = jnp.dtype(x.dtype).itemsize
    out_itemsize = jnp.dtype(out_dtype).itemsize
    rblk, lblk = _choose_blocks(rows, hw, in_itemsize)
    row_steps = _cdiv(rows, rblk)
    lane_steps = _cdiv(hw, lblk)

    # Row r = b*C + c -> channel c = r % C.  Pad so the in-kernel row slice of
    # the last (possibly partial) row block stays in bounds.
    rows_padded = row_steps * rblk
    scale_rows = jnp.tile(scale, B).reshape(rows, 1)
    bias_rows = jnp.tile(bias, B).reshape(rows, 1)
    if rows_padded > rows:
        pad = ((0, rows_padded - rows), (0, 0))
        scale_rows = jnp.pad(scale_rows, pad, constant_values=1.0)
        bias_rows = jnp.pad(bias_rows, pad)

    x2 = x.reshape(rows, hw)                 # metadata-only for contiguous NCHW

    # in + out blocks, double-buffered, plus slack; explicit so one tiling
    # policy is portable across v5e / v6e / v7x scoped-VMEM defaults.
    block_bytes = rblk * lblk * (in_itemsize + out_itemsize)
    vmem_limit = int(max(16 << 20, min(48 << 20, 2 * block_bytes + (4 << 20))))

    alias = {0: 0} if (donate_x and out_dtype == x.dtype) else {}

    out = pl.pallas_call(
        _make_kernel(rblk),
        out_shape=jax.ShapeDtypeStruct((rows, hw), out_dtype),
        grid=(row_steps, lane_steps),
        in_specs=[
            pl.BlockSpec((rblk, lblk), lambda i, j: (i, j)),
            pl.BlockSpec((rows_padded, 1), lambda i, j: (0, 0)),  # resident
            pl.BlockSpec((rows_padded, 1), lambda i, j: (0, 0)),  # resident
        ],
        out_specs=pl.BlockSpec((rblk, lblk), lambda i, j: (i, j)),
        compiler_params=pltpu.CompilerParams(
            dimension_semantics=("parallel", "parallel"),
            vmem_limit_bytes=vmem_limit,
        ),
        input_output_aliases=alias,
    )(x2, scale_rows, bias_rows)
    return out.reshape(B, C, H, W)


input_normalize = jax.jit(_input_normalize_impl,
                          static_argnames=("out_dtype", "donate_x"))


if __name__ == "__main__":
    key = jax.random.PRNGKey(0)

    B, C, H, W = 2, 4, 16, 16
    # Inputs spread a bit outside [0, 1] so the clamp actually does something.
    x = jax.random.uniform(key, (B, C, H, W), dtype=jnp.float32,
                           minval=-0.5, maxval=1.5)
    new_mean = jnp.array([0.485, 0.456, 0.406, 0.5], dtype=jnp.float32)
    new_std = jnp.array([0.229, 0.224, 0.225, 0.25], dtype=jnp.float32)

    out = jax.block_until_ready(input_normalize(x, new_mean, new_std))

    # Pure-JAX reference (original divide form; the reciprocal rewrite only
    # differs at the ~1 ulp level).
    ref = (jnp.clip(x, 0.0, 1.0) - new_mean[None, :, None, None]) / \
        new_std[None, :, None, None]
    assert out.shape == x.shape and out.dtype == x.dtype
    assert jnp.allclose(out, ref, atol=1e-5, rtol=1e-5)

    print("KERNEL_OK")
</pallas_src>

<mosaic_0001>
module attributes {stable_mosaic.version = 11 : i64} {
  func.func @kernel(%arg0: i32, %arg1: i32, %arg2: memref<8x256xf32, #tpu.memory_space<vmem>>, %arg3: memref<8x1xf32, #tpu.memory_space<vmem>>, %arg4: memref<8x1xf32, #tpu.memory_space<vmem>>, %arg5: memref<8x256xf32, #tpu.memory_space<vmem>>) attributes {dimension_semantics = [#tpu.dimension_semantics<parallel>, #tpu.dimension_semantics<parallel>], iteration_bounds = array<i64: 1, 1>, scalar_prefetch = 0 : i64, scratch_operands = 0 : i64, tpu.core_type = #tpu.core_type<tc>, window_params = [{transform_indices = @transform_0, window_bounds = array<i64: 8, 256>}, {pipeline_mode = #tpu.pipeline_mode<synchronous>, transform_indices = @transform_1, window_bounds = array<i64: 8, 1>}, {pipeline_mode = #tpu.pipeline_mode<synchronous>, transform_indices = @transform_2, window_bounds = array<i64: 8, 1>}, {transform_indices = @transform_3, window_bounds = array<i64: 8, 256>}]} {
    %c8_i32 = arith.constant 8 : i32
    %0 = arith.muli %arg0, %c8_i32 : i32
    %1 = tpu.assume_multiple %0, 8 : i32
    %2 = arith.index_cast %1 : i32 to index
    %c0 = arith.constant 0 : index
    %3 = vector.load %arg3[%2, %c0] : memref<8x1xf32, #tpu.memory_space<vmem>>, vector<8x1xf32>
    %4 = arith.index_cast %1 : i32 to index
    %c0_0 = arith.constant 0 : index
    %5 = vector.load %arg4[%4, %c0_0] : memref<8x1xf32, #tpu.memory_space<vmem>>, vector<8x1xf32>
    %c0_1 = arith.constant 0 : index
    %c0_2 = arith.constant 0 : index
    %6 = vector.load %arg2[%c0_1, %c0_2] : memref<8x256xf32, #tpu.memory_space<vmem>>, vector<8x256xf32>
    %cst = arith.constant 0.000000e+00 : f32
    %cst_3 = arith.constant 1.000000e+00 : f32
    %7 = vector.broadcast %cst : f32 to vector<8x256xf32>
    %8 = arith.maximumf %7, %6 : vector<8x256xf32>
    %9 = vector.broadcast %cst_3 : f32 to vector<8x256xf32>
    %10 = arith.minimumf %9, %8 : vector<8x256xf32>
    %11 = vector.broadcast %3 : vector<8x1xf32> to vector<8x256xf32>
    %12 = arith.mulf %10, %11 : vector<8x256xf32>
    %13 = vector.broadcast %5 : vector<8x1xf32> to vector<8x256xf32>
    %14 = arith.addf %12, %13 : vector<8x256xf32>
    %c0_4 = arith.constant 0 : index
    %c0_5 = arith.constant 0 : index
    %15 = vector.load %arg5[%c0_4, %c0_5] : memref<8x256xf32, #tpu.memory_space<vmem>>, vector<8x256xf32>
    tpu.vector_store %arg5[%c0_4, %c0_5], %14 {strides = array<i32>} : memref<8x256xf32, #tpu.memory_space<vmem>>, vector<8x256xf32>,
    return
  }
  func.func @transform_0(%arg0: i32, %arg1: i32) -> (i32, i32) {
    %c0_i32 = arith.constant 0 : i32
    return %arg0, %arg1 : i32, i32
  }
  func.func @transform_1(%arg0: i32, %arg1: i32) -> (i32, i32) {
    %c0_i32 = arith.constant 0 : i32
    %c0_i32_0 = arith.constant 0 : i32
    %c0_i32_1 = arith.constant 0 : i32
    return %c0_i32, %c0_i32_0 : i32, i32
  }
  func.func @transform_2(%arg0: i32, %arg1: i32) -> (i32, i32) {
    %c0_i32 = arith.constant 0 : i32
    %c0_i32_0 = arith.constant 0 : i32
    %c0_i32_1 = arith.constant 0 : i32
    return %c0_i32, %c0_i32_0 : i32, i32
  }
  func.func @transform_3(%arg0: i32, %arg1: i32) -> (i32, i32) {
    %c0_i32 = arith.constant 0 : i32
    return %arg0, %arg1 : i32, i32
  }
}

</mosaic_0001>

<bundles_post_ra>
// kernel: tile.18
= control target key start
LH: loop header
LB: loop body
LE: loop exit
PB: predicated region body
PF: predicated region fallthrough
CT: control target
= control target key end

     0   :  { %s22_s0 = inlined_call_operand.vmem [shape: f32[4], index: 0, kind: input, shape index: {}]   ;;  %s23_s1 = inlined_call_operand.vmem [shape: f32[2,4], index: 1, kind: output, shape index: {}]  }
   0x1   :  { %v4_v0 = vld [vmem:[%s22_s0] ss:$0 sm:$0xff] }
   0x2   :  { %5 = vst [vmem:[%s23_s1] sm:$0x3] %v4_v0 }

// kernel: tile.0
= control target key start
LH: loop header
LB: loop body
LE: loop exit
PB: predicated region body
PF: predicated region fallthrough
CT: control target
= control target key end

     0   :  { %s34_s8 = smov 125   ;;  %vm7_vm0 = vcmask 7168   ;;  %s35_s11 = smov 126   ;;  %s61_s0 = inlined_call_operand.vmem [shape: f32[2,4], index: 0, kind: input, shape index: {}]   ;;  %s62_s1 = inlined_call_operand.vmem [shape: f32[8,1], index: 1, kind: output, shape index: {}]  }
   0x1   :  { %v4_v0 = vld [vmem:[%s61_s0] sm:$0x3]  ;;  %s33_s0 = smov 127  }
   0x2   :  { %5 = vst [vmem:[#allocation0] sm:$0x3] %v4_v0 }
   0x9   :  { %v9_v1 = vld [vmem:[#allocation0] sm:$0x3]  }
   0xa   :  { %v21_v2 = vld [vmem:[#allocation0] sm:$0x3]   ;;  %10 = vrot.lane.b32.xlu0 %v9_v1, %s33_s0 }
   0xb   :  { %22 = vrot.lane.b32.xlu1 %v21_v2, %s34_s8  ;;  %v6_v3 = vld [vmem:[#allocation0] sm:$0x3]  }
   0xc   :  { %v15_v4 = vld [vmem:[#allocation0] sm:$0x3]   ;;  %8 = vst.msk [vmem:[%s62_s1] ss:$4 sm:$0x3] %vm7_vm0, %v6_v3  }
   0xe   :  { %16 = vrot.lane.b32.xlu0 %v15_v4, %s35_s11 }
  0x7c   :  { %v11_v5 = vpop.permute.xlu0 %10  }
  0x7d   :  { %v23_v6 = vpop.permute.xlu1 %22   ;;  %27 = vst.msk [vmem:[%s62_s1 + $0x1] ss:$4 sm:$0x3] %vm7_vm0, %v11_v5  }
  0x7e   :  { %29 = vst.msk [vmem:[%s62_s1 + $0x3] ss:$4 sm:$0x3] %vm7_vm0, %v23_v6  }
  0x80   :  { %v17_v7 = vpop.permute.xlu0 %16  }
  0x81   :  { %28 = vst.msk [vmem:[%s62_s1 + $0x2] ss:$4 sm:$0x3] %vm7_vm0, %v17_v7  }

// kernel: _input_normalize_impl.1
= control target key start
LH: loop header
LB: loop body
LE: loop exit
PB: predicated region body
PF: predicated region fallthrough
CT: control target
= control target key end

     0   :  { %v47_v0 = vmov 0   ;;  %s86_s1 = inlined_call_operand.vmem [shape: f32[8,1], index: 1, kind: input, shape index: {}]   ;;  %s87_s2 = inlined_call_operand.vmem [shape: f32[8,1], index: 2, kind: input, shape index: {}]   ;;  %s88_s0 = inlined_call_operand.vmem [shape: f32[8,256], index: 0, kind: input, shape index: {}]   ;;  %s89_s3 = inlined_call_operand.vmem [shape: f32[8,256], index: 3, kind: output, shape index: {}]  }
   0x1   :  { %46 = vset.pattern.permute.xlu0 %v47_v0  ;;  %v16_v1 = vld [vmem:[%s86_s1] sm:$0xff]  ;;  %v20_v4 = vld [vmem:[%s88_s0 + $0x8] sm:$0xff] }
   0x2   :  { %27 = vperm.xlu0 %46, %v16_v1   ;;  %v18_v2 = vld [vmem:[%s87_s2] sm:$0xff]  ;;  %v22_v6 = vmax.f32 %v20_v4, 0.0 }
   0x3   :  { %v19_v3 = vld [vmem:[%s88_s0] sm:$0xff] }
   0x4   :  { %v21_v5 = vmax.f32 %v19_v3, 0.0  ;;  %v24_v8 = vmin.f32 %v22_v6, 1.0 }
   0x6   :  { %34 = vperm.xlu0 %46, %v18_v2   ;;  %v23_v7 = vmin.f32 %v21_v5, 1.0 }
  0x81   :  { %v28_v9 = vpop.permute.xlu0 %27 }
  0x82   :  { %v30_v10 = vmul.f32 %v28_v9, %v23_v7  ;;  %v31_v11 = vmul.f32 %v28_v9, %v24_v8 }
  0x85   :  { %v35_v12 = vpop.permute.xlu0 %34 }
  0x86   :  { %v37_v13 = vadd.f32 %v35_v12, %v30_v10  ;;  %v38_v14 = vadd.f32 %v35_v12, %v31_v11 }
  0x88   :  { %39 = vst [vmem:[%s89_s3] sm:$0xff] %v37_v13  ;;  %40 = vst [vmem:[%s89_s3 + $0x8] sm:$0xff] %v38_v14 }

</bundles_post_ra>
